<compile_context>
chip_gen: v6e
topology: v6e:2x2x1
jax: 0.10.0
libtpu: 0.0.40
codegen_flags: <defaults>
</compile_context>

<pallas_src>
import functools

import jax
import jax.numpy as jnp
import numpy as np
from jax.experimental import pallas as pl
from jax.experimental.pallas import tpu as pltpu


def _projector_kernel(x_ref, t_ref, wq_ref, wkv_ref, o_ref, *,
                      n_valid, tile_n, compute_dtype):
    x_raw = x_ref[0]                                  # (C, TN) native dtype
    t = t_ref[0].astype(compute_dtype)                # (Ct, L)
    wq = wq_ref[...].astype(compute_dtype)            # (C, C)
    wkv = wkv_ref[...].astype(compute_dtype)          # (2C, Ct)  [W_k ; W_v] fused

    c = x_raw.shape[0]
    inv_sqrt_c = 1.0 / (float(c) ** 0.5)

    x_f32 = x_raw.astype(jnp.float32)                 # residual path stays exact f32
    x_c = x_raw.astype(compute_dtype)                 # in-kernel bf16 cast (VPU, cheap)

    # Ragged final tile: zero out-of-range pixel columns (defensive — OOB columns are
    # independent through softmax and their writes are dropped by Pallas anyway).
    if n_valid % tile_n != 0:
        col0 = pl.program_id(1) * tile_n
        lane = jax.lax.broadcasted_iota(jnp.int32, (1, tile_n), 1)
        x_c = jnp.where(lane < (n_valid - col0), x_c, jnp.zeros_like(x_c))

    # Tiny projections: [K ; V] = Wkv @ T -> (2C, L). Recomputed per tile so the grid
    # carries no state and both axes stay "parallel".
    kv = jnp.dot(wkv, t, preferred_element_type=jnp.float32)
    k = kv[:c]                                        # (C, L) f32
    v = kv[c:].astype(compute_dtype)                  # (C, L)

    # Fold Wq (and 1/sqrt(C)) into K:  W' = (K^T Wq)/sqrt(C) -> (L, C), O(L*C*C) setup.
    wprime = jax.lax.dot_general(
        k.astype(compute_dtype), wq,
        dimension_numbers=(((0,), (0,)), ((), ())),
        preferred_element_type=jnp.float32) * inv_sqrt_c

    # S^T = W' @ X -> (L, TN): token axis on sublanes, pixel axis lane-dense.
    s = jnp.dot(wprime.astype(compute_dtype), x_c,
                preferred_element_type=jnp.float32)

    # softmax over the token axis (PyTorch dim=2) == axis 0 in this layout; f32.
    s = s - jnp.max(s, axis=0, keepdims=True)
    p = jnp.exp(s)
    a = p * pl.reciprocal(jnp.sum(p, axis=0, keepdims=True), approx=True)  # (L, TN)

    # out = X + V @ A : (C, L) @ (L, TN) -> (C, TN); residual add in f32.
    attn = jnp.dot(v, a.astype(compute_dtype), preferred_element_type=jnp.float32)
    o_ref[0] = (x_f32 + attn).astype(o_ref.dtype)


def _vmem_limit_bytes():
    # v5e/v6e: 128 MiB physical (16/32 MiB scoped default); v7x: 64 MiB physical.
    try:
        cap = getattr(pltpu.get_tpu_info(), "vmem_capacity_bytes",
                      128 * 1024 * 1024)
    except Exception:
        cap = 128 * 1024 * 1024
    return int(min(96 * 1024 * 1024, max(32 * 1024 * 1024, (3 * cap) // 4)))


def _pick_tile_n(n, block_n, b):
    """Lane-dense N tile: multiple of 128 (or full N when tiny)."""
    if n <= 128:
        return n
    tn = max(128, (min(block_n, n) // 128) * 128)
    # Keep >= 4 grid steps so both v7x TensorCores get work (no-op on v5e/v6e).
    while tn > 256 and b * pl.cdiv(n, tn) < 4:
        tn = max(128, ((tn // 2) // 128) * 128)
    return tn


@functools.partial(jax.jit, static_argnames=("block_n", "compute_dtype"))
def projector_forward(x_in, t, w_q, w_k, w_v, *, block_n=2048,
                      compute_dtype=jnp.bfloat16):
    """x_in: (B, C, N), t: (B, Ct, L); weights 2-D (out_ch, in_ch) (size-1 conv dim squeezed)."""
    B, C, N = x_in.shape
    _, Ct, L = t.shape
    assert w_q.shape == (C, C) and w_k.shape == (C, Ct) and w_v.shape == (C, Ct)

    # Fuse K/V projection weights once (tiny): (2C, Ct).
    w_kv = jnp.concatenate([w_k, w_v], axis=0)

    tn = _pick_tile_n(N, block_n, B)
    n_tiles = pl.cdiv(N, tn)

    kernel = functools.partial(_projector_kernel, n_valid=N, tile_n=tn,
                               compute_dtype=compute_dtype)

    return pl.pallas_call(
        kernel,
        out_shape=jax.ShapeDtypeStruct((B, C, N), x_in.dtype),
        grid_spec=pltpu.PrefetchScalarGridSpec(
            num_scalar_prefetch=0,
            grid=(B, n_tiles),
            in_specs=[
                pl.BlockSpec((1, C, tn), lambda b, n: (b, 0, n)),    # X_in tile (native dtype)
                pl.BlockSpec((1, Ct, L), lambda b, n: (b, 0, 0)),    # T (tiny, per batch)
                pl.BlockSpec((C, C), lambda b, n: (0, 0)),           # W_q (shared)
                pl.BlockSpec((2 * C, Ct), lambda b, n: (0, 0)),      # [W_k; W_v] (shared)
            ],
            out_specs=pl.BlockSpec((1, C, tn), lambda b, n: (b, 0, n)),
        ),
        compiler_params=pltpu.CompilerParams(
            dimension_semantics=("parallel", "parallel"),   # megacore-safe on v7x
            vmem_limit_bytes=_vmem_limit_bytes(),
        ),
    )(x_in, t, w_q, w_kv)


def projector_reference(x_in, t, w_q, w_k, w_v):
    c = x_in.shape[1]
    q = jnp.einsum("oi,bin->bon", w_q, x_in)
    k = jnp.einsum("oi,bil->bol", w_k, t)
    v = jnp.einsum("oi,bil->bol", w_v, t)
    s = jnp.einsum("bcn,bcl->bnl", q, k) / np.sqrt(c)
    a = jax.nn.softmax(s, axis=2)            # (B, N, L)
    return x_in + jnp.einsum("bcl,bnl->bcn", v, a)


if __name__ == "__main__":
    # Small, module-consistent shapes.
    B = 2       # batch
    C = 32      # feature_map_cs
    Ct = 16     # visual_tokens_cs
    N = 512     # flattened spatial / pixel count
    L = 8       # number of visual tokens

    key = jax.random.PRNGKey(0)
    kx, kt, kq, kk, kv = jax.random.split(key, 5)

    x_in = jax.random.normal(kx, (B, C, N), dtype=jnp.float32)
    t = jax.random.normal(kt, (B, Ct, L), dtype=jnp.float32)

    # Conv1d(kernel_size=1, bias=False) weights, trailing size-1 kernel dim squeezed.
    w_q = 0.1 * jax.random.normal(kq, (C, C), dtype=jnp.float32)
    w_k = 0.1 * jax.random.normal(kk, (C, Ct), dtype=jnp.float32)
    w_v = 0.1 * jax.random.normal(kv, (C, Ct), dtype=jnp.float32)

    ref = projector_reference(x_in, t, w_q, w_k, w_v)

    # Case 1: multi-tile grid (N divisible by the tile).
    out = jax.block_until_ready(
        projector_forward(x_in, t, w_q, w_k, w_v, block_n=128))
    np.testing.assert_allclose(np.asarray(out), np.asarray(ref),
                               rtol=2e-2, atol=2e-2)

    # Case 2: ragged N (exercises the in-kernel lane mask + OOB-dropped writes).
    N2 = 320
    out2 = jax.block_until_ready(
        projector_forward(x_in[:, :, :N2], t, w_q, w_k, w_v, block_n=128))
    np.testing.assert_allclose(np.asarray(out2), np.asarray(ref[:, :, :N2]),
                               rtol=2e-2, atol=2e-2)

    # Case 3: default (large) block_n, exercising the tile-selection heuristic.
    out3 = jax.block_until_ready(projector_forward(x_in, t, w_q, w_k, w_v))
    np.testing.assert_allclose(np.asarray(out3), np.asarray(ref),
                               rtol=2e-2, atol=2e-2)

    print("KERNEL_OK")
</pallas_src>

<mosaic_0001>
module attributes {stable_mosaic.version = 11 : i64} {
  func.func @_projector_kernel(%arg0: i32, %arg1: i32, %arg2: memref<1x32x128xf32, #tpu.memory_space<vmem>>, %arg3: memref<1x16x8xf32, #tpu.memory_space<vmem>>, %arg4: memref<32x32xf32, #tpu.memory_space<vmem>>, %arg5: memref<64x16xf32, #tpu.memory_space<vmem>>, %arg6: memref<1x32x128xf32, #tpu.memory_space<vmem>>) attributes {dimension_semantics = [#tpu.dimension_semantics<parallel>, #tpu.dimension_semantics<parallel>], iteration_bounds = array<i64: 2, 4>, scalar_prefetch = 0 : i64, scratch_operands = 0 : i64, tpu.core_type = #tpu.core_type<tc>, window_params = [{transform_indices = @transform_0, window_bounds = array<i64: 1, 32, 128>}, {transform_indices = @transform_1, window_bounds = array<i64: 1, 16, 8>}, {pipeline_mode = #tpu.pipeline_mode<synchronous>, transform_indices = @transform_2, window_bounds = array<i64: 32, 32>}, {pipeline_mode = #tpu.pipeline_mode<synchronous>, transform_indices = @transform_3, window_bounds = array<i64: 64, 16>}, {transform_indices = @transform_4, window_bounds = array<i64: 1, 32, 128>}]} {
    %c0 = arith.constant 0 : index
    %c0_0 = arith.constant 0 : index
    %c0_1 = arith.constant 0 : index
    %0 = vector.load %arg2[%c0, %c0_0, %c0_1] : memref<1x32x128xf32, #tpu.memory_space<vmem>>, vector<1x32x128xf32>
    %1 = vector.shape_cast %0 : vector<1x32x128xf32> to vector<32x128xf32>
    %c0_2 = arith.constant 0 : index
    %c0_3 = arith.constant 0 : index
    %c0_4 = arith.constant 0 : index
    %2 = vector.load %arg3[%c0_2, %c0_3, %c0_4] : memref<1x16x8xf32, #tpu.memory_space<vmem>>, vector<1x16x8xf32>
    %3 = vector.shape_cast %2 : vector<1x16x8xf32> to vector<16x8xf32>
    %4 = arith.truncf %3 : vector<16x8xf32> to vector<16x8xbf16>
    %c0_5 = arith.constant 0 : index
    %c0_6 = arith.constant 0 : index
    %5 = vector.load %arg4[%c0_5, %c0_6] : memref<32x32xf32, #tpu.memory_space<vmem>>, vector<32x32xf32>
    %6 = arith.truncf %5 : vector<32x32xf32> to vector<32x32xbf16>
    %c0_7 = arith.constant 0 : index
    %c0_8 = arith.constant 0 : index
    %7 = vector.load %arg5[%c0_7, %c0_8] : memref<64x16xf32, #tpu.memory_space<vmem>>, vector<64x16xf32>
    %8 = arith.truncf %7 : vector<64x16xf32> to vector<64x16xbf16>
    %9 = arith.truncf %1 : vector<32x128xf32> to vector<32x128xbf16>
    %cst = arith.constant dense<0.000000e+00> : vector<64x8xf32>
    %10 = tpu.matmul %8, %4, %cst {dimension_numbers = #tpu.dot_dimension_numbers<[1], [0], [0], [1], [0, 0, 1, 1], [], []>} : vector<64x16xbf16>, vector<16x8xbf16>, vector<64x8xf32> -> vector<64x8xf32>
    %11 = vector.extract_strided_slice %10 {offsets = [0, 0], sizes = [32, 8], strides = [1, 1]} : vector<64x8xf32> to vector<32x8xf32>
    %12 = vector.extract_strided_slice %10 {offsets = [32, 0], sizes = [32, 8], strides = [1, 1]} : vector<64x8xf32> to vector<32x8xf32>
    %13 = arith.truncf %12 : vector<32x8xf32> to vector<32x8xbf16>
    %14 = arith.truncf %11 : vector<32x8xf32> to vector<32x8xbf16>
    %cst_9 = arith.constant dense<0.000000e+00> : vector<8x32xf32>
    %15 = tpu.matmul %14, %6, %cst_9 {dimension_numbers = #tpu.dot_dimension_numbers<[0], [0], [1], [1], [0, 1, 1, 1], [], []>} : vector<32x8xbf16>, vector<32x32xbf16>, vector<8x32xf32> -> vector<8x32xf32>
    %cst_10 = arith.constant 0.176776692 : f32
    %16 = vector.broadcast %cst_10 : f32 to vector<8x32xf32>
    %17 = arith.mulf %15, %16 : vector<8x32xf32>
    %18 = arith.truncf %17 : vector<8x32xf32> to vector<8x32xbf16>
    %cst_11 = arith.constant dense<0.000000e+00> : vector<8x128xf32>
    %19 = tpu.matmul %18, %9, %cst_11 {dimension_numbers = #tpu.dot_dimension_numbers<[1], [0], [0], [1], [0, 0, 1, 1], [], []>} : vector<8x32xbf16>, vector<32x128xbf16>, vector<8x128xf32> -> vector<8x128xf32>
    %cst_12 = arith.constant dense<0xFF800000> : vector<128xf32>
    %20 = vector.multi_reduction <maximumf>, %19, %cst_12 [0] : vector<8x128xf32> to vector<128xf32>
    %21 = vector.shape_cast %20 : vector<128xf32> to vector<1x128xf32>
    %22 = vector.broadcast %21 : vector<1x128xf32> to vector<8x128xf32>
    %23 = arith.subf %19, %22 : vector<8x128xf32>
    %24 = math.exp %23 : vector<8x128xf32>
    %cst_13 = arith.constant dense<0.000000e+00> : vector<128xf32>
    %25 = vector.multi_reduction <add>, %24, %cst_13 [0] : vector<8x128xf32> to vector<128xf32>
    %26 = vector.shape_cast %25 : vector<128xf32> to vector<1x128xf32>
    %27 = tpu.reciprocal %26 {approx = true} : vector<1x128xf32> -> vector<1x128xf32>
    %28 = vector.broadcast %27 : vector<1x128xf32> to vector<8x128xf32>
    %29 = arith.mulf %24, %28 : vector<8x128xf32>
    %30 = arith.truncf %29 : vector<8x128xf32> to vector<8x128xbf16>
    %cst_14 = arith.constant dense<0.000000e+00> : vector<32x128xf32>
    %31 = tpu.matmul %13, %30, %cst_14 {dimension_numbers = #tpu.dot_dimension_numbers<[1], [0], [0], [1], [0, 0, 1, 1], [], []>} : vector<32x8xbf16>, vector<8x128xbf16>, vector<32x128xf32> -> vector<32x128xf32>
    %32 = arith.addf %1, %31 : vector<32x128xf32>
    %c0_15 = arith.constant 0 : index
    %c0_16 = arith.constant 0 : index
    %c0_17 = arith.constant 0 : index
    %33 = vector.load %arg6[%c0_15, %c0_16, %c0_17] : memref<1x32x128xf32, #tpu.memory_space<vmem>>, vector<1x32x128xf32>
    %34 = vector.shape_cast %33 : vector<1x32x128xf32> to vector<32x128xf32>
    %35 = vector.shape_cast %32 : vector<32x128xf32> to vector<1x32x128xf32>
    tpu.vector_store %arg6[%c0_15, %c0_16, %c0_17], %35 {strides = array<i32>} : memref<1x32x128xf32, #tpu.memory_space<vmem>>, vector<1x32x128xf32>,
    return
  }
  func.func @transform_0(%arg0: i32, %arg1: i32) -> (i32, i32, i32) {
    %c0_i32 = arith.constant 0 : i32
    %c0_i32_0 = arith.constant 0 : i32
    return %arg0, %c0_i32, %arg1 : i32, i32, i32
  }
  func.func @transform_1(%arg0: i32, %arg1: i32) -> (i32, i32, i32) {
    %c0_i32 = arith.constant 0 : i32
    %c0_i32_0 = arith.constant 0 : i32
    %c0_i32_1 = arith.constant 0 : i32
    return %arg0, %c0_i32, %c0_i32_0 : i32, i32, i32
  }
  func.func @transform_2(%arg0: i32, %arg1: i32) -> (i32, i32) {
    %c0_i32 = arith.constant 0 : i32
    %c0_i32_0 = arith.constant 0 : i32
    %c0_i32_1 = arith.constant 0 : i32
    return %c0_i32, %c0_i32_0 : i32, i32
  }
  func.func @transform_3(%arg0: i32, %arg1: i32) -> (i32, i32) {
    %c0_i32 = arith.constant 0 : i32
    %c0_i32_0 = arith.constant 0 : i32
    %c0_i32_1 = arith.constant 0 : i32
    return %c0_i32, %c0_i32_0 : i32, i32
  }
  func.func @transform_4(%arg0: i32, %arg1: i32) -> (i32, i32, i32) {
    %c0_i32 = arith.constant 0 : i32
    %c0_i32_0 = arith.constant 0 : i32
    return %arg0, %c0_i32, %arg1 : i32, i32, i32
  }
}

</mosaic_0001>

<bundles_post_ra>
// kernel: projector_forward.1
= control target key start
LH: loop header
LB: loop body
LE: loop exit
PB: predicated region body
PF: predicated region fallthrough
CT: control target
= control target key end

     0   :  { %9 = vsyncpa [#allocation3], 0  ;;  %s1237_s0 = inlined_call_operand.hbm [shape: f32[2,32,512], index: 0, kind: input, shape index: {}]   ;;  %s1238_s1 = inlined_call_operand.vmem [shape: f32[2,16,8], index: 1, kind: input, shape index: {}]   ;;  %s1239_s2 = inlined_call_operand.vmem [shape: f32[32,32], index: 2, kind: input, shape index: {}]   ;;  %s1240_s3 = inlined_call_operand.vmem [shape: f32[64,16], index: 3, kind: input, shape index: {}]   ;;  %s1241_s4 = inlined_call_operand.hbm [shape: f32[2,32,512], index: 4, kind: output, shape index: {}]  }
   0x1   :  { %11 = vsyncpa [#allocation3 + $0x1], 0 }
   0x2   :  { %12 = vsyncpa [#allocation4], 0 }
   0x3   :  { %14 = vsyncpa [#allocation4 + $0x1], 0  ;;  %s994_s15 = smov 0   ;;  %s996_s16 = smov 0  }
   0x4   :  { %s998_s17 = smov 0   ;;  %s1000_s18 = smov 0  }
   0x5   :  { %s1002_s19 = smov 0   ;;  %s1004_s20 = smov 0  }
   0x6   :  { %s1006_s21 = smov 0   ;;  %s1008_s22 = smov 0  }
   0x7 LB: > { %1245 = sst [smem:[#allocation8_spill]] %s929_s15  ;;  %s669_s23 = sadd.s32 4294967295, %s957_s22   ;;  %s957_s22 = sphi %s1008_s22, %s20_s22   ;;  %s953_s21 = sphi %s1006_s21, %s1262_s21   ;;  %s949_s20 = sphi %s1004_s20, %s1261_s20   ;;  %s945_s19 = sphi %s1002_s19, %s1260_s19   ;;  %s941_s18 = sphi %s1000_s18, %s1259_s18   ;;  %s937_s17 = sphi %s998_s17, %s1258_s17   ;;  %s933_s16 = sphi %s996_s16, %s1257_s16   ;;  %s929_s15 = sphi %s994_s15, %s1256_s15  }
   0x8   : > { %s670_s24 = sadd.s32 4294967294, %s957_s22   ;;  %s29_s25 = sadd.s32 1, %s949_s20 }
   0x9   : > { %s32_s26 = sadd.s32 1, %s953_s21  ;;  %p30_p0 = scmp.ge.s32.totalorder %s29_s25, 4 }
   0xa   : > { %s41_s27 = sadd.s32 1, %s937_s17  ;;  %p48_p1 = scmp.ne.s32.totalorder %s937_s17, %s933_s16 }
   0xb   : > { %p49_p2 = scmp.eq.s32.totalorder %s957_s22, 0  ;;  %s1264_s25 = smov (%p30_p0, %s29_s25), 0 }
   0xc   : > { %1246 = sst [smem:[#allocation9_spill]] %s1264_s25  ;;  %s1266_s26 = smov (!%p30_p0, %s32_s26), %s953_s21 }
   0xd   : > { %s37_s28 = ssub.s32 %s949_s20, %s1264_s25  ;;  %p1047_p3 = por %p49_p2, %p48_p1 }
   0xe   : > { %p34_p4 = scmp.ge.s32.totalorder %s1266_s26, 2  ;;  %p54_p5 = scmp.ne.s32.totalorder %s933_s16, %s929_s15 }
   0xf   : > { %p55_p6 = scmp.eq.s32.totalorder %s669_s23, 0  ;;  %p148_p7 = scmp.eq.s32.totalorder %s669_s23, 7 }
  0x10   : > { %s1268_s26 = smov (%p34_p4, %s1266_s26), 0  ;;  %p154_p10 = scmp.eq.s32.totalorder %s670_s24, 7 }
  0x11   : > { %1248 = sst [smem:[#allocation10_spill]] %s1268_s26  ;;  %p1055_p8 = por %p55_p6, %p54_p5 }
  0x12   : > { %p1059_p9 = por %p148_p7, %p48_p1  ;;  %s36_s6 = ssub.s32 %s953_s21, %s1268_s26 }
  0x13   : > { %s38_s7 = sor.u32 %s37_s28, %s36_s6  ;;  %p1065_p12 = por %p154_p10, %p54_p5 }
  0x14   : > { %p39_p11 = scmp.eq.s32.totalorder %s38_s7, 0  ;;  %p754_p13 = scmp.lt.s32.totalorder %s957_s22, 8 }
  0x15   : > { %s180_s9 = sand.u32 1, %s937_s17   ;;  %s674_s12 = sshll.u32 %s953_s21, 4 }
  0x16   : > { %s1072_s10 = scalar_select %p39_p11, %s937_s17, %s41_s27  }
  0x17   : > { %s673_s11 = sshll.u32 %s180_s9, 5  ;;  %s189_s13 = sadd.s32 %s949_s20, %s674_s12 }
  0x18   : > { %s184_s14 = scalar_lea.vmem [#allocation2], %s673_s11  ;;  %s675_s25 = sshll.u32 %s189_s13, 7 }
  0x19   : > { %s192_s23 = sshll.u32 %s184_s14, 4  ;;  %s191_s24 = scalar_lea.hbm %s1237_s0, %s675_s25  ;;  %s193_s23 = int_to_ptr.vmem [resolvable:$true] %s192_s23 }
  0x1a   : > { %p1081_p0 = pnand %p754_p13, %p1047_p3  ;;  %s181_s6 = scalar_lea.sflag [#allocation3], %s180_s9 }
  0x1b   : > { %s846_s27 = scalar_lea.vmem %s193_s23, 512  ;;  %s959_s7 = smov [#allocation2]  }
  0x1c   : > { %p835_p1 = pneg %p1081_p0  ;;  %p847_p2 = scmp.ne.s32.totalorder %s193_s23, %s846_s27 }
  0x1d   : > { %s851_s11 = sshll.u32 %s959_s7, 4  ;;  %s852_s11 = int_to_ptr.vmem [resolvable:$false] %s851_s11 }
  0x1e   : > { %p849_p4 = pnand %p847_p2, %p835_p1  ;;  %s853_s12 = scalar_lea.vmem %s852_s11, 1024 }
  0x1f   : > { %p854_p6 = scmp.lt.s32.totalorder %s193_s23, %s852_s11  ;;  %p855_p7 = scmp.lt.s32.totalorder %s853_s12, %s846_s27 }
  0x20   : > { %p850_p5 = pneg %p849_p4 }
  0x21   : > { %p856_p10 = por %p855_p7, %p854_p6 }
  0x23   : > { %p857_p11 = pnand %p856_p10, %p850_p5 }
  0x25   : > { %860 = shalt.err (!%p857_p11)
}
  0x26   : > { %s960_s15 = smov 512   ;;  %s961_s25 = smov 128  }
  0x27   : > { %s962_s26 = smov 8   ;;  %p676_p3 = scmp.ge.s32.totalorder %s957_s22, 1 }
  0x28   : > { %749 = dma.hbm_to_vmem [thread:$0]  (!%p1081_p0), %s191_s24, 512, %s193_s23, %s181_s6, %s960_s15, %s961_s25, %s962_s26  }
  0x29   : > { %p208_p13 = scmp.lt.s32.totalorder %s957_s22, 9 }
  0x2b   : > { %p209_p1 = pnand %p676_p3, %p208_p13 }
  0x2c   : > { %s1092_s29 = sand.u32 (!%p209_p1), 1, %s933_s16  }
  0x2d   : > { %212 = sbr.rel (%p209_p1) target bundleno = 1034 (0x40a), region = 36  ;;  %s677_s9 = sshll.u32 (!%p209_p1), %s1092_s29, 5 }
  0x2e   : > { %s215_s13 = scalar_lea.sflag (!%p209_p1), [#allocation3], %s1092_s29  ;;  %s1098_s14 = scalar_lea.vmem (!%p209_p1), [#allocation2], %s677_s9 }
  0x32   : > { %920 = dma.done.wait (%p1055_p8), %s215_s13, 512  }
  0x33   : > { %922 = vsyncadd (%p1055_p8), %s215_s13, 4294966784  ;;  %p248_p0 = scmp.lt.s32.totalorder %s945_s19, 1  ;;  %v267_v2 = vld [vmem:[%s1240_s3] sm:$0xff]  ;;  %v268_v4 = vld [vmem:[%s1240_s3 + $0x8] sm:$0xff]  ;;  %vm281_vm0 = vcmask 130048   ;;  %v963_v12 = vmov 0.0  }
  0x34   : > { %v269_v5 = vld [vmem:[%s1240_s3 + $0x10] sm:$0xff]  ;;  %v270_v6 = vld [vmem:[%s1240_s3 + $0x18] sm:$0xff]  ;;  %v275_v7 = vpack.c.bf16 %v268_v4, %v267_v2  ;;  %v261_v11 = vld [vmem:[%s1239_s2] sm:$0xff]  ;;  %719 = vmatprep.subr.bf16.mxu1 %v963_v12  ;;  %vm964_vm1 = vmmov 0   ;;  %vm379_vm2 = vcmask 261120   ;;  %vm486_vm3 = vcmask 64512  }
  0x35   : > { %s249_s23 = scalar_select %p248_p0, %s945_s19, 1  ;;  %v276_v8 = vpack.c.bf16 %v270_v6, %v269_v5  ;;  %v263_v9 = vld [vmem:[%s1239_s2 + $0x10] sm:$0xff]  ;;  %v264_v10 = vld [vmem:[%s1239_s2 + $0x18] sm:$0xff]  ;;  %v262_v14 = vld [vmem:[%s1239_s2 + $0x8] sm:$0xff]  ;;  %723 = vmatprep.mubr.msk.bf16.mxu1 %vm964_vm1, %v963_v12  ;;  %vm493_vm4 = vcmask 1043456  }
  0x36   : > { %711 = vmatprep.mubr.msk.bf16.mxu0 %vm281_vm0, %v275_v7  ;;  %v266_v13 = vpack.c.bf16 %v264_v10, %v263_v9  ;;  %v265_v15 = vpack.c.bf16 %v262_v14, %v261_v11  ;;  %v1137_v22 = vld [vmem:[%s1098_s14 + $0x10] sm:$0xff]  ;;  %v1140_v23 = vld [vmem:[%s1098_s14 + $0x18] sm:$0xff]  ;;  %v1147_v26 = vld [vmem:[%s1098_s14] sm:$0xff]  ;;  %s690_s28 = sshll.u32 %s945_s19, 4  ;;  %s555_s12 = scalar_lea.sflag [#allocation4], %s1092_s29 }
  0x37   : > { %s694_s24 = sshll.u32 %s249_s23, 4  ;;  %v280_v24 = vpack.c.bf16 %v1140_v23, %v1137_v22  ;;  %v1150_v27 = vld [vmem:[%s1098_s14 + $0x8] sm:$0xff]  ;;  %v271_v29 = vld [vmem:[%s1240_s3 + $0x20] sm:$0xff]  ;;  %v273_v31 = vld [vmem:[%s1240_s3 + $0x30] sm:$0xff]  ;;  %s566_s6 = sadd.s32 %s941_s18, %s690_s28 }
  0x38   : > { %s252_s27 = scalar_lea.vmem %s1238_s1, %s694_s24  ;;  %720 = vmatpush3.bf16.msra.mxu1 %v266_v13  ;;  %v279_v28 = vpack.c.bf16 %v1150_v27, %v1147_v26  ;;  %v272_v30 = vld [vmem:[%s1240_s3 + $0x28] sm:$0xff]  ;;  %v274_v33 = vld [vmem:[%s1240_s3 + $0x38] sm:$0xff]  ;;  %s691_s11 = sshll.u32 %s566_s6, 7 }
  0x39   : > { %v258_v0 = vld [vmem:[%s252_s27] sm:$0xff]  ;;  %v259_v1 = vld [vmem:[%s252_s27 + $0x8] sm:$0xff]  ;;  %721 = vmatprep.subr.bf16.mxu1 %v963_v12  ;;  %v277_v32 = vpack.c.bf16 %v272_v30, %v271_v29  ;;  %v278_v34 = vpack.c.bf16 %v274_v33, %v273_v31  ;;  %s247_s27 = scalar_lea.vmem [#allocation5], %s677_s9  ;;  %s1183_s9 = scalar_lea.hbm %s1241_s4, %s691_s11 }
  0x3a   : > { %v260_v3 = vpack.c.bf16 %v259_v1, %v258_v0  ;;  %s569_s7 = sshll.u32 %s247_s27, 4  ;;  %s965_s30 = smov [#allocation5]   ;;  %s1177_s7 = int_to_ptr.vmem [resolvable:$true] %s569_s7 }
  0x3b   : > { %s861_s15 = scalar_lea.vmem %s1177_s7, 512  ;;  %s865_s25 = sshll.u32 %s965_s30, 4  ;;  %s866_s25 = int_to_ptr.vmem [resolvable:$false] %s865_s25 }
  0x3c   : > { %709 = vmatprep.subr.bf16.mxu0 %v260_v3  ;;  %722 = vmatpush3.bf16.msra.mxu1 %v265_v15  ;;  %p862_p8 = scmp.ne.s32.totalorder %s1177_s7, %s861_s15  ;;  %s867_s26 = scalar_lea.vmem %s866_s25, 1024 }
  0x3d   : > { %710 = vmatpush3.bf16.msra.mxu0 %v260_v3  ;;  %727 = vmatprep.subr.bf16.mxu1 %v963_v12  ;;  %p868_p5 = scmp.lt.s32.totalorder %s1177_s7, %s866_s25  ;;  %p869_p6 = scmp.lt.s32.totalorder %s867_s26, %s861_s15 }
  0x3e   : > { %p863_p2 = pnand %p862_p8, %p1059_p9 }
  0x3f   : > { %p870_p7 = por %p869_p6, %p868_p5 }
  0x40   : > { %712 = vmatmul.mubr.msk.bf16.vlgmr.msra.gmra.mxu0 %vm281_vm0, %v276_v8  ;;  %p864_p4 = pneg %p863_p2 }
  0x41   : > { %715 = vmatprep.mubr.msk.bf16.mxu0 %vm281_vm0, %v277_v32 }
  0x42   : > { %p871_p10 = pnand %p870_p7, %p864_p4 }
  0x48   : > { %716 = vmatmul.mubr.msk.bf16.gmra.mxu0 %vm281_vm0, %v278_v34 }
 0x100   : > { %v713_v16 = vpop.f32.mrf.mxu0 }
 0x102   : > { %v328_v17 = vpop.f32.mrf.mxu0 }
 0x104   : > { %v714_v18 = vpop.f32.mrf.mxu0 }
 0x105   : > { %v362_v21 = vpack.c.bf16 %v714_v18, %v713_v16 }
 0x106   : > { %v331_v19 = vpop.f32.mrf.mxu0 }
 0x107   : > { %v361_v20 = vpack.c.bf16 %v331_v19, %v328_v17 }
 0x108   : > { %v717_v41 = vpop.f32.mrf.mxu0 }
 0x109   : > { %363 = vxpose.xlu0.c.b16.start [1/2] (short) (narrow) %v361_v20, 16 }
 0x10a   : > { %v344_v42 = vpop.f32.mrf.mxu0 }
 0x10c   : > { %v718_v43 = vpop.f32.mrf.mxu0 }
 0x10d   : > { %364 = vxpose.xlu0.c.b16.end [2/2] (short) (narrow) %v362_v21, 16  ;;  %v360_v44 = vpack.c.bf16 %v718_v43, %v717_v41 }
 0x10e   : > { %v347_v45 = vpop.f32.mrf.mxu0 }
 0x10f   : > { %v359_v46 = vpack.c.bf16 %v347_v45, %v344_v42 }
 0x111   : > { %737 = vmatprep.mubr.msk.bf16.mxu0 %vm486_vm3, %v359_v46 }
 0x16b   : > { %v371_v25 = vpop.trf.xlu0 }
 0x16c   : > { %724 = vmatmul.mubr.msk.bf16.vlgmr.msra.gmra.mxu1 %vm379_vm2, %v371_v25 }
 0x16d   : > { %728 = vmatpush3.bf16.msra.mxu1 %v280_v24  ;;  %731 = vmatprep.mubr.msk.bf16.mxu1 %vm964_vm1, %v963_v12 }
 0x16e   : > { %729 = vmatprep.subr.bf16.mxu1 %v963_v12 }
 0x171   : > { %730 = vmatpush3.bf16.msra.mxu1 %v279_v28 }
 0x22c   : > { %v417_v35 = vpop.f32.mrf.mxu1 }
 0x22d   : > { %v423_v36 = vmul.f32 0.17677669, %v417_v35 }
 0x22e   : > { %v725_v37 = vpop.f32.mrf.mxu1 }
 0x22f   : > { %v424_v38 = vpack.c.bf16 %v423_v36, %v423_v36 }
 0x230   : > { %v420_v39 = vpop.f32.mrf.mxu1 }
 0x231   : > { %732 = vmatmul.mubr.msk.bf16.vlgmr.msra.gmra.mxu1 %vm379_vm2, %v424_v38 }
 0x232   : > { %v726_v40 = vpop.f32.mrf.mxu1 }
 0x2f1   : > { %v462_v47 = vpop.f32.mrf.mxu1 }
 0x2f2   : > { %v468_v48 = vrot.slane %v462_v47, 4 }
 0x2f3   : > { %v733_v49 = vpop.f32.mrf.mxu1 }
 0x2f4   : > { %v469_v50 = vmax.f32 %v462_v47, %v468_v48 }
 0x2f5   : > { %v465_v51 = vpop.f32.mrf.mxu1 }
 0x2f6   : > { %v470_v52 = vrot.slane %v469_v50, 2 }
 0x2f7   : > { %v734_v53 = vpop.f32.mrf.mxu1 }
 0x2f8   : > { %v471_v54 = vmax.f32 %v469_v50, %v470_v52 }
 0x2fa   : > { %v472_v55 = vrot.slane %v471_v54, 1 }
 0x2fc   : > { %v473_v56 = vmax.f32 %v471_v54, %v472_v55 }
 0x2fe   : > { %v474_v57 = vsub.f32 %v462_v47, %v473_v56 }
 0x300   : > { %v475_v58 = vmul.f32 1.442695, %v474_v57 }
 0x302   : > { %829 = vpow2.f32 %v475_v58 }
 0x30f   : > { %v830_v59 = vpop.eup %829 }
 0x310   : > { %v477_v60 = vrot.slane %v830_v59, 4 }
 0x312   : > { %v478_v61 = vadd.f32 %v830_v59, %v477_v60 }
 0x314   : > { %v479_v62 = vrot.slane %v478_v61, 2 }
 0x316   : > { %v480_v63 = vadd.f32 %v479_v62, %v478_v61 }
 0x318   : > { %v481_v0 = vrot.slane %v480_v63, 1 }
 0x31a   : > { %v482_v1 = vadd.f32 %v481_v0, %v480_v63 }
 0x31c   : > { %831 = vrcp.f32 %v482_v1 }
 0x329   : > { %v832_v2 = vpop.eup %831 }
 0x32a   : > { %v484_v3 = vmul.f32 %v832_v2, %v830_v59 }
 0x32c   : > { %v485_v4 = vpack.c.bf16 %v484_v3, %v484_v3 }
 0x32e   : > { %741 = vmatprep.subr.msk.bf16.mxu0 %vm493_vm4, %v485_v4  ;;  %v495_v5 = vsel %vm493_vm4, %v485_v4, 0 }
 0x32f   : > { %736 = vmatpush3.bf16.msra.mxu0 %v495_v5 }
 0x332   : > { %738 = vmatmul.mubr.msk.bf16.vlgmr.msra.gmra.mxu0 %vm486_vm3, %v360_v44 }
 0x3f2   : > { %v739_v6 = vpop.f32.mrf.mxu0 }
 0x3f3   : > { %v548_v7 = vadd.f32 %v739_v6, %v1137_v22 }
 0x3f4   : > { %v531_v8 = vpop.f32.mrf.mxu0 }
 0x3f5   : > { %552 = vst [vmem:[%s247_s27 + $0x10] sm:$0xff] %v548_v7  ;;  %v546_v9 = vadd.f32 %v531_v8, %v1147_v26 }
 0x3f6   : > { %v740_v10 = vpop.f32.mrf.mxu0 }
 0x3f7   : > { %550 = vst [vmem:[%s247_s27] sm:$0xff] %v546_v9  ;;  %v549_v11 = vadd.f32 %v740_v10, %v1140_v23 }
 0x3f8   : > { %v534_v12 = vpop.f32.mrf.mxu0 }
 0x3f9   : > { %553 = vst [vmem:[%s247_s27 + $0x18] sm:$0xff] %v549_v11  ;;  %v547_v13 = vadd.f32 %v534_v12, %v1150_v27 }
 0x3fb   : > { %551 = vst [vmem:[%s247_s27 + $0x8] sm:$0xff] %v547_v13 }
 0x3fc   : > { %874 = shalt.err (!%p871_p10)
}
 0x3fd   : > { %s875_s13 = scalar_lea.hbm %s1183_s9, 512  ;;  %s879_s14 = scalar_lea.hbm %s1241_s4, 4096 }
 0x3fe   : > { %p876_p11 = scmp.ne.s32.totalorder %s1183_s9, %s875_s13  ;;  %p880_p1 = scmp.lt.s32.totalorder %s1183_s9, %s1241_s4 }
 0x3ff   : > { %p881_p0 = scmp.lt.s32.totalorder %s879_s14, %s875_s13 }
 0x400   : > { %p877_p3 = pnand %p876_p11, %p1059_p9 }
 0x401   : > { %p882_p8 = por %p881_p0, %p880_p1 }
 0x402   : > { %p878_p13 = pneg %p877_p3 }
 0x404   : > { %p883_p2 = pnand %p882_p8, %p878_p13 }
 0x406   : > { %886 = shalt.err (!%p883_p2)
}
 0x407   : > { %s966_s27 = smov 128   ;;  %s967_s11 = smov 512  }
 0x408   : > { %s968_s18 = smov 8  }
 0x409   : > { %744 = dma.vmem_to_hbm [thread:$0]  (%p1059_p9), %s1177_s7, 512, %s1183_s9, %s555_s12, %s966_s27, %s967_s11, %s968_s18  }
 0x40a PF: > { %s1253_s19 = sld [smem:[#allocation8_spill]]  ;;  %p755_p4 = scmp.ge.s32.totalorder %s957_s22, 2 }
 0x40c   : > { %p751_p5 = pnand %p755_p4, %p1065_p12 }
 0x40e   : > { %p752_p6 = pneg %p751_p5 }
 0x410   : > { %s584_s15 = sand.u32 1, %s1253_s19  }
 0x411   : > { %s585_s30 = scalar_lea.sflag [#allocation4], %s584_s15 }
 0x412   : > { %924 = dma.done.wait (%p752_p6), %s585_s30, 512  }
 0x413   : > { %926 = vsyncadd (%p752_p6), %s585_s30, 4294966784  ;;  %s20_s22 = sadd.s32 1, %s957_s22   ;;  %s1254_s5 = sld [smem:[#allocation9_spill]] }
 0x414   : > { %p17_p7 = scmp.ge.s32.totalorder %s20_s22, 10   ;;  %s1255_s29 = sld [smem:[#allocation10_spill]] }
 0x415   : > { %s1256_s15 = smov %s933_s16  ;;  %s1257_s16 = smov %s937_s17 }
 0x416   : > { %s1258_s17 = smov %s1072_s10  ;;  %s1259_s18 = smov %s949_s20 }
 0x417   : > { %s1260_s19 = smov %s953_s21  ;;  %19 = sbr.rel (!%p17_p7) target bundleno = 7 (0x7), region = 84 }
 0x419   : > { %s1261_s20 = smov %s1254_s5 }
 0x41a   : > { %s1262_s21 = smov %s1255_s29 }
 0x41c   :  { %590 = vsyncpa [#allocation3], 1 }
 0x41d   :  { %592 = vsyncpa [#allocation3 + $0x1], 1 }
 0x41e   :  { %593 = vsyncpa [#allocation4], 1 }
 0x41f   :  { %595 = vsyncpa [#allocation4 + $0x1], 1 }

</bundles_post_ra>
